<compile_context>
chip_gen: v5e
topology: v5e:2x2
jax: 0.10.0
libtpu: 0.0.40
codegen_flags: <defaults>
</compile_context>

<pallas_src>
import numpy as np
import jax
import jax.numpy as jnp
from jax.experimental import pallas as pl
from jax.experimental.pallas import tpu as pltpu


def _round_up(x, m):
    return -(-x // m) * m


def _col_selector(W, Wo, rx, dtype):
    """One-hot (W, rx*Wo) selector: output column dx*Wo + j picks input column j*rx + dx."""
    S = np.zeros((W, rx * Wo), np.float32)
    for dx in range(rx):
        S[np.arange(Wo) * rx + dx, dx * Wo + np.arange(Wo)] = 1.0
    return jnp.asarray(S, dtype=dtype)


def _vmem_budget_and_limit():
    """Per-generation VMEM sizing (conservative v7x numbers if unqueryable)."""
    try:
        phys = int(pltpu.get_tpu_info().vmem_capacity_bytes)
    except Exception:
        phys = 64 * 1024 * 1024  # v7x per-TC VMEM: the safest assumption
    limit = (phys * 3) // 4      # vmem_limit_bytes handed to Mosaic
    budget = (phys * 3) // 8     # what the tile chooser may spend
    return phys, budget, limit


def _choose_tc(B, C, Ho, Wo, W, ry, rx, itemsize, budget):
    """Largest channel tile TC (divisor of C) that fits the VMEM budget + layout rules."""
    sub = max(8, 32 // itemsize)            # sublane packing: 8 f32, 16 bf16, 32 i8
    lane_in = _round_up(ry * W, 128)
    lane_out = _round_up(Wo, 128)
    lane_s = _round_up(rx * Wo, 128)
    s_bytes = 2 * _round_up(W, sub) * lane_s * itemsize   # selector, double-buffered

    def tile_bytes(tc):
        in_b = _round_up(tc * Ho, sub) * lane_in * itemsize
        out_b = tc * ry * rx * _round_up(Ho, sub) * lane_out * itemsize
        return 2 * (in_b + out_b)           # double-buffered input + output blocks

    # Dtype-aware legality on the input block's second-minor dim (TC*Ho).
    legal = [d for d in range(1, C + 1)
             if C % d == 0 and ((d * Ho) % sub == 0 or d == C)]
    fits = [d for d in legal if tile_bytes(d) + s_bytes <= budget]
    cands = fits if fits else [min(legal)]  # min(legal) = smallest legal footprint
    # Keep >= 2 grid steps when possible so v7x can shard across its 2 TCs.
    multi = [d for d in cands if B * (C // d) >= 2]
    tc = max(multi) if multi else max(cands)
    return tc, tile_bytes(tc) + s_bytes


def pixel_unshuffle(x, ry=2, rx=2):
    B, C, H, W = x.shape
    assert H % ry == 0 and W % rx == 0, "H/W must be divisible by ry/rx"
    if not jnp.issubdtype(x.dtype, jnp.floating):
        # TODO(synk): integer dtypes need a non-MXU de-interleave path.
        raise NotImplementedError("pixel_unshuffle Pallas kernel supports float dtypes only")

    Ho, Wo = H // ry, W // rx
    itemsize = int(np.dtype(x.dtype).itemsize)
    out_dtype = x.dtype

    phys, budget, limit = _vmem_budget_and_limit()
    TC, needed = _choose_tc(B, C, Ho, Wo, W, ry, rx, itemsize, budget)
    vmem_limit = int(max(limit, min(needed + (4 << 20), phys)))

    S = _col_selector(W, Wo, rx, x.dtype)

    def kernel(x_ref, s_ref, o_ref):
        # x_ref: (1, TC*Ho, ry*W)   s_ref: (W, rx*Wo)   o_ref: (1, TC, ry*rx, Ho, Wo)
        for dy in range(ry):
            # Free lane slice: row (c*Ho + i) of this slab is x[b, c, i*ry + dy, :].
            rows = x_ref[0, :, dy * W:(dy + 1) * W]                 # (TC*Ho, W)
            if rx > 1:
                # One fused MXU matmul per dy; one-hot selector => exact in out_dtype.
                acc = jnp.dot(rows, s_ref[...],
                              preferred_element_type=out_dtype)     # (TC*Ho, rx*Wo)
            else:
                acc = rows
            for dx in range(rx):
                plane = acc[:, dx * Wo:(dx + 1) * Wo]               # (TC*Ho, Wo)
                # Single dense store per (dy, dx) plane.
                o_ref[0, :, dy * rx + dx] = plane.reshape(TC, Ho, Wo)

    # Free metadata reshape of NCHW: x_flat[b, c*Ho + i, dy*W + w] == x[b, c, i*ry + dy, w].
    x_flat = x.reshape(B, C * Ho, ry * W)

    y5 = pl.pallas_call(
        kernel,
        out_shape=jax.ShapeDtypeStruct((B, C, ry * rx, Ho, Wo), x.dtype),
        grid_spec=pltpu.PrefetchScalarGridSpec(
            num_scalar_prefetch=0,
            grid=(B, C // TC),
            in_specs=[
                # TC channels' worth of (de-strided) rows per grid step.
                pl.BlockSpec((1, TC * Ho, ry * W), lambda b, cb: (b, cb, 0)),
                # Small 0/1 selector matrix, fully resident.
                pl.BlockSpec((W, rx * Wo), lambda b, cb: (0, 0)),
            ],
            out_specs=pl.BlockSpec((1, TC, ry * rx, Ho, Wo),
                                   lambda b, cb: (b, cb, 0, 0, 0)),
        ),
        compiler_params=pltpu.CompilerParams(
            dimension_semantics=("parallel", "parallel"),
            vmem_limit_bytes=vmem_limit,
        ),
        cost_estimate=pl.CostEstimate(
            flops=(2 * B * C * H * W * W) if rx > 1 else 0,
            transcendentals=0,
            bytes_accessed=2 * B * C * H * W * itemsize,
        ),
    )(x_flat, S)

    # Free metadata reshape back to the PyTorch module's NCHW output layout.
    return y5.reshape(B, C * ry * rx, Ho, Wo)


def _reference(x, ry=2, rx=2):
    B, C, H, W = x.shape
    xr = x.reshape(B, C, H // ry, ry, W // rx, rx)
    xr = jnp.transpose(xr, (0, 1, 3, 5, 2, 4))
    return xr.reshape(B, C * ry * rx, H // ry, W // rx)


if __name__ == "__main__":
    key = jax.random.PRNGKey(0)
    x = jax.random.normal(key, (2, 4, 16, 16), dtype=jnp.float32)

    y = pixel_unshuffle(x, ry=2, rx=2)
    y = jax.block_until_ready(y)

    ref = _reference(x, ry=2, rx=2)
    assert y.shape == (2, 16, 8, 8), y.shape
    assert y.dtype == x.dtype
    assert jnp.allclose(y, ref), "Pallas PixelUnshuffle mismatch vs JAX reference"
    print("KERNEL_OK")
</pallas_src>

<mosaic_0001>
module attributes {stable_mosaic.version = 11 : i64} {
  func.func @kernel(%arg0: i32, %arg1: i32, %arg2: memref<1x32x32xf32, #tpu.memory_space<vmem>>, %arg3: memref<16x16xf32, #tpu.memory_space<vmem>>, %arg4: memref<1x4x4x8x8xf32, #tpu.memory_space<vmem>>) attributes {dimension_semantics = [#tpu.dimension_semantics<parallel>, #tpu.dimension_semantics<parallel>], iteration_bounds = array<i64: 2, 1>, scalar_prefetch = 0 : i64, scratch_operands = 0 : i64, tpu.core_type = #tpu.core_type<tc>, window_params = [{transform_indices = @transform_0, window_bounds = array<i64: 1, 32, 32>}, {pipeline_mode = #tpu.pipeline_mode<synchronous>, transform_indices = @transform_1, window_bounds = array<i64: 16, 16>}, {transform_indices = @transform_2, window_bounds = array<i64: 1, 4, 4, 8, 8>}]} {
    %c0 = arith.constant 0 : index
    %c0_0 = arith.constant 0 : index
    %c0_1 = arith.constant 0 : index
    %0 = vector.load %arg2[%c0, %c0_0, %c0_1] : memref<1x32x32xf32, #tpu.memory_space<vmem>>, vector<1x32x16xf32>
    %1 = vector.shape_cast %0 : vector<1x32x16xf32> to vector<32x16xf32>
    %c0_2 = arith.constant 0 : index
    %c0_3 = arith.constant 0 : index
    %2 = vector.load %arg3[%c0_2, %c0_3] : memref<16x16xf32, #tpu.memory_space<vmem>>, vector<16x16xf32>
    %cst = arith.constant dense<0.000000e+00> : vector<32x16xf32>
    %3 = tpu.matmul %1, %2, %cst {dimension_numbers = #tpu.dot_dimension_numbers<[1], [0], [0], [1], [0, 0, 1, 1], [], []>} : vector<32x16xf32>, vector<16x16xf32>, vector<32x16xf32> -> vector<32x16xf32>
    %4 = vector.extract_strided_slice %3 {offsets = [0, 0], sizes = [32, 8], strides = [1, 1]} : vector<32x16xf32> to vector<32x8xf32>
    %5 = vector.shape_cast %4 : vector<32x8xf32> to vector<4x8x8xf32>
    %c0_4 = arith.constant 0 : index
    %c0_5 = arith.constant 0 : index
    %c0_6 = arith.constant 0 : index
    %c0_7 = arith.constant 0 : index
    %c0_8 = arith.constant 0 : index
    %6 = vector.load %arg4[%c0_4, %c0_5, %c0_6, %c0_7, %c0_8] : memref<1x4x4x8x8xf32, #tpu.memory_space<vmem>>, vector<1x4x1x8x8xf32>
    %7 = vector.shape_cast %6 : vector<1x4x1x8x8xf32> to vector<4x8x8xf32>
    %8 = vector.shape_cast %5 : vector<4x8x8xf32> to vector<1x4x1x8x8xf32>
    tpu.vector_store %arg4[%c0_4, %c0_5, %c0_6, %c0_7, %c0_8], %8 {strides = array<i32>} : memref<1x4x4x8x8xf32, #tpu.memory_space<vmem>>, vector<1x4x1x8x8xf32>,
    %9 = vector.extract_strided_slice %3 {offsets = [0, 8], sizes = [32, 8], strides = [1, 1]} : vector<32x16xf32> to vector<32x8xf32>
    %10 = vector.shape_cast %9 : vector<32x8xf32> to vector<4x8x8xf32>
    %c0_9 = arith.constant 0 : index
    %c0_10 = arith.constant 0 : index
    %c1 = arith.constant 1 : index
    %c0_11 = arith.constant 0 : index
    %c0_12 = arith.constant 0 : index
    %11 = vector.load %arg4[%c0_9, %c0_10, %c1, %c0_11, %c0_12] : memref<1x4x4x8x8xf32, #tpu.memory_space<vmem>>, vector<1x4x1x8x8xf32>
    %12 = vector.shape_cast %11 : vector<1x4x1x8x8xf32> to vector<4x8x8xf32>
    %13 = vector.shape_cast %10 : vector<4x8x8xf32> to vector<1x4x1x8x8xf32>
    tpu.vector_store %arg4[%c0_9, %c0_10, %c1, %c0_11, %c0_12], %13 {strides = array<i32>} : memref<1x4x4x8x8xf32, #tpu.memory_space<vmem>>, vector<1x4x1x8x8xf32>,
    %c0_13 = arith.constant 0 : index
    %c0_14 = arith.constant 0 : index
    %c16 = arith.constant 16 : index
    %14 = vector.load %arg2[%c0_13, %c0_14, %c16] : memref<1x32x32xf32, #tpu.memory_space<vmem>>, vector<1x32x16xf32>
    %15 = vector.shape_cast %14 : vector<1x32x16xf32> to vector<32x16xf32>
    %c0_15 = arith.constant 0 : index
    %c0_16 = arith.constant 0 : index
    %16 = vector.load %arg3[%c0_15, %c0_16] : memref<16x16xf32, #tpu.memory_space<vmem>>, vector<16x16xf32>
    %cst_17 = arith.constant dense<0.000000e+00> : vector<32x16xf32>
    %17 = tpu.matmul %15, %16, %cst_17 {dimension_numbers = #tpu.dot_dimension_numbers<[1], [0], [0], [1], [0, 0, 1, 1], [], []>} : vector<32x16xf32>, vector<16x16xf32>, vector<32x16xf32> -> vector<32x16xf32>
    %18 = vector.extract_strided_slice %17 {offsets = [0, 0], sizes = [32, 8], strides = [1, 1]} : vector<32x16xf32> to vector<32x8xf32>
    %19 = vector.shape_cast %18 : vector<32x8xf32> to vector<4x8x8xf32>
    %c0_18 = arith.constant 0 : index
    %c0_19 = arith.constant 0 : index
    %c2 = arith.constant 2 : index
    %c0_20 = arith.constant 0 : index
    %c0_21 = arith.constant 0 : index
    %20 = vector.load %arg4[%c0_18, %c0_19, %c2, %c0_20, %c0_21] : memref<1x4x4x8x8xf32, #tpu.memory_space<vmem>>, vector<1x4x1x8x8xf32>
    %21 = vector.shape_cast %20 : vector<1x4x1x8x8xf32> to vector<4x8x8xf32>
    %22 = vector.shape_cast %19 : vector<4x8x8xf32> to vector<1x4x1x8x8xf32>
    tpu.vector_store %arg4[%c0_18, %c0_19, %c2, %c0_20, %c0_21], %22 {strides = array<i32>} : memref<1x4x4x8x8xf32, #tpu.memory_space<vmem>>, vector<1x4x1x8x8xf32>,
    %23 = vector.extract_strided_slice %17 {offsets = [0, 8], sizes = [32, 8], strides = [1, 1]} : vector<32x16xf32> to vector<32x8xf32>
    %24 = vector.shape_cast %23 : vector<32x8xf32> to vector<4x8x8xf32>
    %c0_22 = arith.constant 0 : index
    %c0_23 = arith.constant 0 : index
    %c3 = arith.constant 3 : index
    %c0_24 = arith.constant 0 : index
    %c0_25 = arith.constant 0 : index
    %25 = vector.load %arg4[%c0_22, %c0_23, %c3, %c0_24, %c0_25] : memref<1x4x4x8x8xf32, #tpu.memory_space<vmem>>, vector<1x4x1x8x8xf32>
    %26 = vector.shape_cast %25 : vector<1x4x1x8x8xf32> to vector<4x8x8xf32>
    %27 = vector.shape_cast %24 : vector<4x8x8xf32> to vector<1x4x1x8x8xf32>
    tpu.vector_store %arg4[%c0_22, %c0_23, %c3, %c0_24, %c0_25], %27 {strides = array<i32>} : memref<1x4x4x8x8xf32, #tpu.memory_space<vmem>>, vector<1x4x1x8x8xf32>,
    return
  }
  func.func @transform_0(%arg0: i32, %arg1: i32) -> (i32, i32, i32) {
    %c0_i32 = arith.constant 0 : i32
    %c0_i32_0 = arith.constant 0 : i32
    return %arg0, %arg1, %c0_i32 : i32, i32, i32
  }
  func.func @transform_1(%arg0: i32, %arg1: i32) -> (i32, i32) {
    %c0_i32 = arith.constant 0 : i32
    %c0_i32_0 = arith.constant 0 : i32
    %c0_i32_1 = arith.constant 0 : i32
    return %c0_i32, %c0_i32_0 : i32, i32
  }
  func.func @transform_2(%arg0: i32, %arg1: i32) -> (i32, i32, i32, i32, i32) {
    %c0_i32 = arith.constant 0 : i32
    %c0_i32_0 = arith.constant 0 : i32
    %c0_i32_1 = arith.constant 0 : i32
    %c0_i32_2 = arith.constant 0 : i32
    return %arg0, %arg1, %c0_i32, %c0_i32_0, %c0_i32_1 : i32, i32, i32, i32, i32
  }
}

</mosaic_0001>

<bundles_post_ra>
// kernel: tpu_custom_call.1
= control target key start
LH: loop header
LB: loop body
LE: loop exit
PB: predicated region body
PF: predicated region fallthrough
CT: control target
= control target key end

     0   :  { %7 = vsyncpa [#allocation3], 0  ;;  %s963_s0 = inlined_call_operand.hbm [shape: f32[2,32,32], index: 0, kind: input, shape index: {}]   ;;  %s964_s1 = inlined_call_operand.hbm [shape: f32[16,16], index: 1, kind: input, shape index: {}]   ;;  %s965_s2 = inlined_call_operand.hbm [shape: f32[2,4,4,8,8], index: 2, kind: output, shape index: {}]  }
   0x1   :  { %9 = vsyncpa [#allocation3 + $0x1], 0 }
   0x2   :  { %10 = vsyncpa [#allocation6], 0 }
   0x3   :  { %11 = vsyncpa [#allocation4], 0 }
   0x4   :  { %13 = vsyncpa [#allocation4 + $0x1], 0  ;;  %s764_s9 = smov 0   ;;  %s766_s10 = smov 0  }
   0x5   :  { %s768_s11 = smov 0   ;;  %s770_s12 = smov 0  }
   0x6   :  { %s772_s13 = smov 0   ;;  %s774_s14 = smov 0  }
   0x7 LB: > { %s472_s15 = sadd.s32 4294967295, %s740_s14   ;;  %s473_s16 = sadd.s32 4294967294, %s740_s14   ;;  %s740_s14 = sphi %s774_s14, %s19_s14   ;;  %s736_s13 = sphi %s772_s13, %s977_s13   ;;  %s732_s12 = sphi %s770_s12, %s976_s12   ;;  %s728_s11 = sphi %s768_s11, %s975_s11   ;;  %s724_s10 = sphi %s766_s10, %s974_s10   ;;  %s720_s9 = sphi %s764_s9, %s973_s9  }
   0x8   : > { %p53_p0 = scmp.ne.s32.totalorder %s724_s10, %s720_s9  ;;  %p798_p1 = scmp.eq.s32.totalorder %s472_s15, 0 }
   0x9   : > { %p802_p2 = scmp.eq.s32.totalorder %s472_s15, 1  ;;  %p106_p3 = scmp.eq.s32.totalorder %s473_s16, 1 }
   0xa   : > { %p808_p4 = por %p798_p1, %p53_p0  ;;  %p474_p5 = scmp.ge.s32.totalorder %s740_s14, 1 }
   0xb   : > { %p813_p6 = por %p106_p3, %p53_p0  ;;  %p113_p7 = scmp.lt.s32.totalorder %s740_s14, 3 }
   0xc   : > { %s124_s23 = sshll.u32 %s964_s1, 4  ;;  %s742_s25 = smov [#allocation5]   ;;  %s125_s23 = int_to_ptr.hbm [resolvable:$true] %s124_s23 }
   0xd   : > { %p821_p8 = pnand %p474_p5, %p113_p7  ;;  %s126_s26 = sshll.u32 %s742_s25, 4  ;;  %s127_s26 = int_to_ptr.vmem [resolvable:$true] %s126_s26 }
   0xe   : > { %p476_p11 = scmp.ge.s32.totalorder %s740_s14, 2  ;;  %s743_s27 = smov 128  }
   0xf   : > { %p523_p9 = pneg %p821_p8  ;;  %s744_s28 = smov 8  }
  0x10   : > { %s31_s29 = sadd.s32 1, %s736_s13  ;;  %s40_s30 = sadd.s32 1, %s728_s11 }
  0x11   : > { %p524_p10 = pnand %p523_p9, %p798_p1  ;;  %p33_p12 = scmp.ge.s32.totalorder %s31_s29, 2 }
  0x12   : > { %p47_p13 = scmp.ne.s32.totalorder %s728_s11, %s724_s10  ;;  %p48_p0 = scmp.eq.s32.totalorder %s740_s14, 0 }
  0x13   : > { %526 = dma.hbm_to_vmem [thread:$0]  (!%p524_p10), %s125_s23, 256, %s127_s26, [#allocation6], %s743_s27, %s743_s27, %s744_s28  }
  0x14   : > { %s979_s29 = smov (%p33_p12, %s31_s29), 0  ;;  %p840_p3 = por %p48_p0, %p47_p13 }
  0x15   : > { %p846_p5 = por %p802_p2, %p47_p13  ;;  %s35_s5 = ssub.s32 %s736_s13, %s979_s29 }
  0x16   : > { %p536_p7 = scmp.lt.s32.totalorder %s740_s14, 2  ;;  %p38_p9 = scmp.eq.s32.totalorder %s35_s5, 0 }
  0x17   : > { %s140_s6 = sand.u32 1, %s728_s11   ;;  %s509_s15 = sshll.u32 %s736_s13, 5 }
  0x18   : > { %s477_s7 = sshll.u32 %s140_s6, 5  ;;  %s151_s22 = scalar_lea.hbm %s963_s0, %s509_s15 }
  0x19   : > { %s855_s8 = scalar_select %p38_p9, %s728_s11, %s40_s30  }
  0x1a   : > { %s144_s23 = scalar_lea.vmem [#allocation2], %s477_s7  ;;  %s152_s18 = sshll.u32 %s151_s22, 4  ;;  %s153_s18 = int_to_ptr.hbm [resolvable:$true] %s152_s18 }
  0x1b   : > { %s154_s25 = sshll.u32 %s144_s23, 4  ;;  %p528_p2 = pnand %p536_p7, %p840_p3  ;;  %s155_s25 = int_to_ptr.vmem [resolvable:$true] %s154_s25 }
  0x1c   : > { %s141_s26 = scalar_lea.sflag [#allocation3], %s140_s6  ;;  %166 = sbr.rel (%p821_p8) target bundleno = 413 (0x19d), region = 28 }
  0x1d   : > { %530 = dma.hbm_to_vmem [thread:$0]  (!%p528_p2), %s153_s18, 512, %s155_s25, %s141_s26, %s743_s27, %s743_s27, %s744_s28  }
  0x1e   : > { %s869_s30 = sand.u32 (!%p821_p8), 1, %s724_s10  }
  0x1f   : > { %s481_s5 = sshll.u32 (!%p821_p8), %s869_s30, 5  ;;  %s169_s7 = scalar_lea.sflag (!%p821_p8), [#allocation3], %s869_s30 }
  0x20   : > { %s172_s15 = scalar_lea.vmem (!%p821_p8), [#allocation2], %s481_s5 }
  0x21   : > { %707 = dma.done.wait (%p808_p4), %s169_s7, 512  }
  0x22   : > { %709 = vsyncadd (%p808_p4), %s169_s7, 4294966784 }
  0x23   : > { %711 = dma.done.wait (%p798_p1), [#allocation6], 256  }
  0x24   : > { %713 = vsyncadd (%p798_p1), [#allocation6], 4294967040  ;;  %v277_v0 = vld [vmem:[%s172_s15 + $0x10] sm:$0xff]  ;;  %v278_v1 = vld [vmem:[%s172_s15 + $0x18] sm:$0xff]  ;;  %s745_s24 = smov 112   ;;  %vm207_vm0 = vcmask 130048  }
  0x25   : > { %289 = vrot.lane.b32.xlu0 %v277_v0, %s745_s24  ;;  %291 = vrot.lane.b32.xlu1 %v278_v1, %s745_s24  ;;  %v206_v2 = vld [vmem:[#allocation5 + $0x8] sm:$0xff]  ;;  %v205_v3 = vld [vmem:[#allocation5] sm:$0xff]  ;;  %s483_s17 = sshll.u32 %s869_s30, 7  ;;  %vm249_vm1 = vcmask 64512   ;;  %s746_s27 = smov 120  }
  0x26   : > { %511 = vmatpush.msra.mxu2 %v206_v2  ;;  %234 = vmatpush.msra.mxu0 %v206_v2  ;;  %v275_v4 = vld [vmem:[%s172_s15] sm:$0xff]  ;;  %v276_v5 = vld [vmem:[%s172_s15 + $0x8] sm:$0xff]  ;;  %s889_s19 = scalar_lea.vmem [#allocation7], %s483_s17  ;;  %s510_s28 = sshll.u32 %s732_s12, 7 }
  0x27   : > { %513 = vmatpush.msra.mxu3 %v206_v2  ;;  %315 = vmatpush.msra.mxu1 %v206_v2  ;;  %s371_s16 = scalar_lea.hbm %s965_s2, %s510_s28  ;;  %s372_s21 = sshll.u32 %s889_s19, 4  ;;  %s373_s21 = int_to_ptr.vmem [resolvable:$true] %s372_s21 }
  0x28   : > { %512 = vmatpush.msra.mxu2 %v205_v3  ;;  %235 = vmatpush.msra.mxu0 %v205_v3  ;;  %s374_s22 = sshll.u32 %s371_s16, 4  ;;  %s357_s23 = scalar_lea.sflag [#allocation4], %s869_s30  ;;  %s375_s22 = int_to_ptr.hbm [resolvable:$true] %s374_s22 }
  0x29   : > { %486 = vmatmul.msk.f32.vlgmr.msra.gmra.mxu2 %vm207_vm0, %v277_v0  ;;  %484 = vmatmul.msk.f32.vlgmr.msra.gmra.mxu0 %vm207_vm0, %v275_v4  ;;  %s668_s25 = sshra.s32 %s375_s22, 4  ;;  %s674_s5 = scalar_lea.hbm %s965_s2, 256  ;;  %s669_s25 = int_to_ptr.hbm [resolvable:$true] %s668_s25 }
  0x2a   : > { %514 = vmatpush.msra.mxu3 %v205_v3  ;;  %316 = vmatpush.msra.mxu1 %v205_v3  ;;  %s670_s18 = scalar_lea.hbm %s669_s25, 128  ;;  %p675_p10 = scmp.lt.s32.totalorder %s669_s25, %s965_s2 }
  0x2b   : > { %p671_p1 = scmp.ne.s32.totalorder %s669_s25, %s670_s18  ;;  %p676_p12 = scmp.lt.s32.totalorder %s674_s5, %s670_s18 }
  0x2d   : > { %285 = vrot.lane.b32.xlu0 %v275_v4, %s745_s24  ;;  %287 = vrot.lane.b32.xlu1 %v276_v5, %s745_s24  ;;  %p672_p4 = pnand %p671_p1, %p846_p5  ;;  %p677_p13 = por %p676_p12, %p675_p10 }
  0x2f   : > { %p673_p8 = pneg %p672_p4 }
  0x31   : > { %487 = vmatmul.msk.f32.gmra.mxu2 %vm207_vm0, %v278_v1  ;;  %485 = vmatmul.msk.f32.gmra.mxu0 %vm207_vm0, %v276_v5  ;;  %p678_p0 = pnand %p677_p13, %p673_p8 }
  0x97   : > { %v290_v6 = vpop.permute.xlu0 %289  ;;  %v292_v7 = vpop.permute.xlu1 %291 }
  0x98   : > { %494 = vmatmul.msk.f32.vlgmr.msra.gmra.mxu3 %vm207_vm0, %v290_v6 }
  0x9f   : > { %v286_v8 = vpop.permute.xlu0 %285  ;;  %v288_v9 = vpop.permute.xlu1 %287 }
  0xa0   : > { %492 = vmatmul.msk.f32.vlgmr.msra.gmra.mxu1 %vm207_vm0, %v286_v8  ;;  %495 = vmatmul.msk.f32.gmra.mxu3 %vm207_vm0, %v292_v7 }
  0xa6   : > { %v237_v10 = vpop.f32.mrf.mxu0 }
  0xa7   : > { %250 = vst.msk [vmem:[%s889_s19] sm:$0xff] %vm249_vm1, %v237_v10  ;;  %258 = vrot.lane.b32.xlu2 %v237_v10, %s746_s27 }
  0xa8   : > { %493 = vmatmul.msk.f32.gmra.mxu1 %vm207_vm0, %v288_v9 }
  0xac   : > { %v243_v11 = vpop.f32.mrf.mxu2 }
  0xad   : > { %252 = vst.msk [vmem:[%s889_s19 + $0x40] sm:$0xff] %vm249_vm1, %v243_v11  ;;  %262 = vrot.lane.b32.xlu0 %v243_v11, %s746_s27 }
  0xae   : > { %v240_v12 = vpop.f32.mrf.mxu0 }
  0xaf   : > { %251 = vst.msk [vmem:[%s889_s19 + $0x20] sm:$0xff] %vm249_vm1, %v240_v12  ;;  %260 = vrot.lane.b32.xlu2 %v240_v12, %s746_s27 }
  0xb4   : > { %v246_v13 = vpop.f32.mrf.mxu2 }
  0xb5   : > { %253 = vst.msk [vmem:[%s889_s19 + $0x60] sm:$0xff] %vm249_vm1, %v246_v13  ;;  %264 = vrot.lane.b32.xlu1 %v246_v13, %s746_s27 }
 0x101   : > { %v259_v14 = vpop.permute.xlu2 %258 }
 0x102   : > { %488 = vst.msk [vmem:[%s889_s19 + $0x8] sm:$0xff] %vm249_vm1, %v259_v14 }
 0x109   : > { %v261_v15 = vpop.permute.xlu2 %260 }
 0x10a   : > { %489 = vst.msk [vmem:[%s889_s19 + $0x28] sm:$0xff] %vm249_vm1, %v261_v15 }
 0x11b   : > { %v324_v16 = vpop.f32.mrf.mxu3 }
 0x11c   : > { %498 = vst.msk [vmem:[%s889_s19 + $0x50] sm:$0xff] %vm249_vm1, %v324_v16  ;;  %343 = vrot.lane.b32.xlu1 %v324_v16, %s746_s27 }
 0x11d   : > { %v318_v17 = vpop.f32.mrf.mxu1 }
 0x11e   : > { %496 = vst.msk [vmem:[%s889_s19 + $0x10] sm:$0xff] %vm249_vm1, %v318_v17  ;;  %339 = vrot.lane.b32.xlu2 %v318_v17, %s746_s27 }
 0x11f   : > { %v263_v21 = vpop.permute.xlu0 %262 }
 0x120   : > { %490 = vst.msk [vmem:[%s889_s19 + $0x48] sm:$0xff] %vm249_vm1, %v263_v21 }
 0x123   : > { %v327_v18 = vpop.f32.mrf.mxu3 }
 0x124   : > { %499 = vst.msk [vmem:[%s889_s19 + $0x70] sm:$0xff] %vm249_vm1, %v327_v18 }
 0x125   : > { %v321_v19 = vpop.f32.mrf.mxu1 }
 0x126   : > { %497 = vst.msk [vmem:[%s889_s19 + $0x30] sm:$0xff] %vm249_vm1, %v321_v19  ;;  %341 = vrot.lane.b32.xlu0 %v321_v19, %s746_s27  ;;  %345 = vrot.lane.b32.xlu2 %v327_v18, %s746_s27 }
 0x127   : > { %v265_v20 = vpop.permute.xlu1 %264 }
 0x128   : > { %491 = vst.msk [vmem:[%s889_s19 + $0x68] sm:$0xff] %vm249_vm1, %v265_v20 }
 0x178   : > { %v340_v22 = vpop.permute.xlu2 %339 }
 0x179   : > { %500 = vst.msk [vmem:[%s889_s19 + $0x18] sm:$0xff] %vm249_vm1, %v340_v22 }
 0x180   : > { %v346_v23 = vpop.permute.xlu2 %345 }
 0x181   : > { %503 = vst.msk [vmem:[%s889_s19 + $0x78] sm:$0xff] %vm249_vm1, %v346_v23 }
 0x18e   : > { %v344_v24 = vpop.permute.xlu1 %343 }
 0x18f   : > { %502 = vst.msk [vmem:[%s889_s19 + $0x58] sm:$0xff] %vm249_vm1, %v344_v24 }
 0x198   : > { %v342_v25 = vpop.permute.xlu0 %341 }
 0x199   : > { %501 = vst.msk [vmem:[%s889_s19 + $0x38] sm:$0xff] %vm249_vm1, %v342_v25 }
 0x19a   : > { %681 = shalt.err (!%p678_p0)
}
 0x19b   : > { %s747_s30 = smov 128   ;;  %s748_s24 = smov 8  }
 0x19c   : > { %521 = dma.vmem_to_hbm [thread:$0]  (%p846_p5), %s373_s21, 2048, %s375_s22, %s357_s23, %s747_s30, %s747_s30, %s748_s24  }
 0x19d PF: > { %s389_s17 = sand.u32 1, %s720_s9   ;;  %p532_p3 = pnand %p476_p11, %p813_p6 }
 0x19e   : > { %s390_s19 = scalar_lea.sflag [#allocation4], %s389_s17 }
 0x19f   : > { %p533_p7 = pneg %p532_p3 }
 0x1a1   : > { %715 = dma.done.wait (%p533_p7), %s390_s19, 2048  }
 0x1a2   : > { %717 = vsyncadd (%p533_p7), %s390_s19, 4294965248  ;;  %s19_s14 = sadd.s32 1, %s740_s14   ;;  %s973_s9 = smov %s724_s10 }
 0x1a3   : > { %p16_p9 = scmp.ge.s32.totalorder %s19_s14, 4   ;;  %s974_s10 = smov %s728_s11 }
 0x1a4   : > { %s975_s11 = smov %s855_s8  ;;  %s976_s12 = smov %s736_s13 }
 0x1a5   : > { %s977_s13 = smov %s979_s29  ;;  %18 = sbr.rel (!%p16_p9) target bundleno = 7 (0x7), region = 80 }
 0x1aa   :  { %396 = vsyncpa [#allocation3], 1 }
 0x1ab   :  { %398 = vsyncpa [#allocation3 + $0x1], 1 }
 0x1ac   :  { %399 = vsyncpa [#allocation6], 1 }
 0x1ad   :  { %400 = vsyncpa [#allocation4], 1 }
 0x1ae   :  { %402 = vsyncpa [#allocation4 + $0x1], 1 }

</bundles_post_ra>
